<compile_context>
chip_gen: v5e
topology: v5e:2x2
jax: 0.10.0
libtpu: 0.0.40
codegen_flags: <defaults>
</compile_context>

<pallas_src>
import functools

import jax
import jax.numpy as jnp
from jax.experimental import pallas as pl
from jax.experimental.pallas import tpu as pltpu


# ----------------------------------------------------------------------------
# Helpers
# ----------------------------------------------------------------------------
def _round_up(x, m):
    return (x + m - 1) // m * m


def _pick_seq_tile(n, target):
    """Sequence tile: full extent if small, else the largest multiple-of-8 divisor <= target."""
    if n <= target:
        return n
    for t in range(target, 7, -8):
        if n % t == 0:
            return t
    # TODO(synk): padded-and-masked KV/Q tiles for sequences with no clean divisor.
    return n


def _prepare_weight(w, compute_dtype, tn_target=512):
    """One-time weight prep: choose the output tile, pad N to a tile multiple, cast.

    Returns (w_padded_cast, logical_N, tn).  K is never padded because the GEMM uses a
    single full-K step (block dim == full array dim is always legal).
    """
    _, N = w.shape
    if N <= tn_target:
        tn, Np = N, N
    elif N % tn_target == 0:
        tn, Np = tn_target, N
    else:
        tn = tn_target
        Np = _round_up(N, tn)
        w = jnp.pad(w, ((0, 0), (0, Np - N)))
    return w.astype(compute_dtype), N, tn


# ----------------------------------------------------------------------------
# Projection GEMM kernels: single K step, f32 accumulation, in-kernel activation cast,
# optional fused bias.
# ----------------------------------------------------------------------------
def _matmul_kernel(x_ref, w_ref, o_ref):
    x = x_ref[...].astype(w_ref.dtype)          # activation cast rides in VALU slack
    o_ref[...] = jnp.dot(x, w_ref[...],
                         preferred_element_type=jnp.float32).astype(o_ref.dtype)


def _matmul_bias_kernel(x_ref, w_ref, b_ref, o_ref):
    x = x_ref[...].astype(w_ref.dtype)
    acc = jnp.dot(x, w_ref[...], preferred_element_type=jnp.float32)
    o_ref[...] = (acc + b_ref[...]).astype(o_ref.dtype)


def pallas_matmul(x, w_prep, bias=None, out_dtype=None, tm_target=512):
    """x: (M, K) [any float dtype], w_prep: output of _prepare_weight -> (M, N)."""
    w, N, tn = w_prep
    M, K = x.shape
    assert w.shape[0] == K, (w.shape, x.shape)
    Np = w.shape[1]
    out_dtype = w.dtype if out_dtype is None else out_dtype

    tm = _round_up(M, 8) if M <= tm_target else tm_target
    Mp = _round_up(M, tm)
    if Mp != M:
        x = jnp.pad(x, ((0, Mp - M), (0, 0)))

    in_specs = [
        pl.BlockSpec((tm, K), lambda i, j: (i, 0)),   # full-K block: one K step
        pl.BlockSpec((K, tn), lambda i, j: (0, j)),
    ]
    operands = [x, w]
    if bias is not None:
        in_specs.append(pl.BlockSpec((1, tn), lambda i, j: (0, j)))
        operands.append(bias)
        kernel = _matmul_bias_kernel
    else:
        kernel = _matmul_kernel

    out = pl.pallas_call(
        kernel,
        out_shape=jax.ShapeDtypeStruct((Mp, Np), out_dtype),
        grid_spec=pltpu.PrefetchScalarGridSpec(
            num_scalar_prefetch=0,
            grid=(Mp // tm, Np // tn),
            in_specs=in_specs,
            out_specs=pl.BlockSpec((tm, tn), lambda i, j: (i, j)),
        ),
        compiler_params=pltpu.CompilerParams(
            dimension_semantics=("parallel", "parallel"),
            vmem_limit_bytes=32 * 1024 * 1024,
        ),
    )(*operands)

    if (Mp, Np) != (M, N):
        out = out[:M, :N]
    return out


# ----------------------------------------------------------------------------
# Flash-style attention kernel (online softmax over KV tiles, head-major scratch)
# ----------------------------------------------------------------------------
def _flash_attention_kernel(q_ref, k_ref, v_ref, o_ref, m_sc, l_sc, acc_sc,
                            *, heads, dim_head):
    H, d = heads, dim_head
    ki = pl.program_id(2)

    @pl.when(ki == 0)
    def _():
        m_sc[...] = jnp.full_like(m_sc, -jnp.inf)
        l_sc[...] = jnp.zeros_like(l_sc)
        acc_sc[...] = jnp.zeros_like(acc_sc)

    for h in range(H):                         # static unroll over heads
        sl = slice(h * d, (h + 1) * d)
        qh = q_ref[0, :, sl]                   # (tq, d)
        kh = k_ref[0, :, sl]                   # (tk, d)
        vh = v_ref[0, :, sl]                   # (tk, d)
        # scores: contract the d axis of both operands -> no k transpose / relayout
        s = jax.lax.dot_general(qh, kh, (((1,), (1,)), ((), ())),
                                preferred_element_type=jnp.float32)       # (tq, tk)
        m_prev = m_sc[h]                       # (tq, 1)
        m_new = jnp.maximum(m_prev, jnp.max(s, axis=-1, keepdims=True))
        alpha = jnp.exp(m_prev - m_new)
        p = jnp.exp(s - m_new)
        l_sc[h] = alpha * l_sc[h] + jnp.sum(p, axis=-1, keepdims=True)
        acc_sc[h] = alpha * acc_sc[h] + jnp.dot(p.astype(vh.dtype), vh,
                                                preferred_element_type=jnp.float32)
        m_sc[h] = m_new

    @pl.when(ki == pl.num_programs(2) - 1)
    def _():
        for h in range(H):
            sl = slice(h * d, (h + 1) * d)
            inv_l = pl.reciprocal(l_sc[h], approx=True)     # EUP slot, ~free
            # straight per-head (tq, d) store into the 'b n (h d)' output layout
            o_ref[0, :, sl] = (acc_sc[h] * inv_l).astype(o_ref.dtype)


def pallas_attention(q_arr, k_arr, v_arr, *, heads, dim_head,
                     q_col=0, k_col=0, v_col=0,
                     q_tile=256, kv_tile=512, out_dtype=None):
    """softmax(q k^T) v per head.

    q_arr/k_arr/v_arr may be the same fused projection tensor; the per-tensor column
    block index (q_col/k_col/v_col, in units of `inner`) selects the Q/K/V slab through
    the BlockSpec index map, so no wrapper-side slicing/copy is needed.
    """
    B, Nq, _ = q_arr.shape
    _, Nk, _ = k_arr.shape
    inner = heads * dim_head
    out_dtype = q_arr.dtype if out_dtype is None else out_dtype

    tq = _pick_seq_tile(Nq, q_tile)
    tk = _pick_seq_tile(Nk, kv_tile)

    # VMEM budget guard (v7x: 64 MiB total / 32 MiB scoped default; v5e default 16 MiB).
    lane = 128
    in_b = jnp.dtype(q_arr.dtype).itemsize
    out_b = jnp.dtype(out_dtype).itemsize
    inner_pad = _round_up(inner, lane)
    d_pad = _round_up(dim_head, lane)
    vmem_limit = 32 * 1024 * 1024
    est = 2 * (tq * inner_pad + 2 * tk * inner_pad) * in_b      # double-buffered inputs
    est += 2 * tq * inner_pad * out_b                           # double-buffered output
    est += heads * tq * (d_pad + 2 * lane) * 4                  # acc + m + l scratch
    assert est <= vmem_limit, (
        f"attention tile choice needs ~{est} bytes VMEM (> {vmem_limit}); "
        "reduce q_tile/kv_tile")  # TODO(synk): padded-and-masked tiles for huge sequences

    kernel = functools.partial(_flash_attention_kernel, heads=heads, dim_head=dim_head)
    return pl.pallas_call(
        kernel,
        out_shape=jax.ShapeDtypeStruct((B, Nq, inner), out_dtype),
        grid_spec=pltpu.PrefetchScalarGridSpec(
            num_scalar_prefetch=0,
            grid=(B, Nq // tq, Nk // tk),
            in_specs=[
                pl.BlockSpec((1, tq, inner), lambda b, qi, ki, c=q_col: (b, qi, c)),
                pl.BlockSpec((1, tk, inner), lambda b, qi, ki, c=k_col: (b, ki, c)),
                pl.BlockSpec((1, tk, inner), lambda b, qi, ki, c=v_col: (b, ki, c)),
            ],
            out_specs=pl.BlockSpec((1, tq, inner), lambda b, qi, ki: (b, qi, 0)),
            scratch_shapes=[
                pltpu.VMEM((heads, tq, 1), jnp.float32),          # running max m
                pltpu.VMEM((heads, tq, 1), jnp.float32),          # running denom l
                pltpu.VMEM((heads, tq, dim_head), jnp.float32),   # running numerator
            ],
        ),
        compiler_params=pltpu.CompilerParams(
            dimension_semantics=("parallel", "parallel", "arbitrary"),
            vmem_limit_bytes=vmem_limit,
        ),
    )(q_arr, k_arr, v_arr)


# ----------------------------------------------------------------------------
# Module wrapper
# ----------------------------------------------------------------------------
class AttentionPallas:
    def __init__(self, query_dim, context_dim=None, heads=8, dim_head=64,
                 dropout=0.0, key=None, compute_dtype=jnp.bfloat16):
        inner_dim = dim_head * heads
        context_dim = query_dim if context_dim is None else context_dim
        self.scale = dim_head ** (-0.5)
        self.heads = heads
        self.dim_head = dim_head
        self.query_dim = query_dim
        self.compute_dtype = compute_dtype

        key = jax.random.PRNGKey(42) if key is None else key
        k1, k2, k3, k4 = jax.random.split(key, 4)
        # Deterministic synthetic weights (stored (in, out) so y = x @ W).
        w_q = jax.random.normal(k1, (query_dim, inner_dim), jnp.float32) * (query_dim ** -0.5)
        w_kv = jax.random.normal(k2, (context_dim, inner_dim * 2), jnp.float32) * (context_dim ** -0.5)
        w_out = jax.random.normal(k3, (inner_dim, query_dim), jnp.float32) * (inner_dim ** -0.5)
        b_out = jax.random.normal(k4, (query_dim,), jnp.float32) * 0.01

        # f32 copies for the independent reference check.
        self.ref_w_q, self.ref_w_kv, self.ref_w_out, self.b_out = w_q, w_kv, w_out, b_out

        # Fold the softmax scale into W_q (zero runtime cost).  Pre-pad + pre-cast ONCE.
        w_q_scaled = w_q * self.scale
        self.w_q_p = _prepare_weight(w_q_scaled, compute_dtype)
        self.w_kv_p = _prepare_weight(w_kv, compute_dtype)
        self.w_qkv_p = _prepare_weight(jnp.concatenate([w_q_scaled, w_kv], axis=1),
                                       compute_dtype)
        self.w_out_p = _prepare_weight(w_out, compute_dtype)
        np_out = self.w_out_p[0].shape[1]
        self.b_out_pad = jnp.pad(b_out.reshape(1, -1).astype(jnp.float32),
                                 ((0, 0), (0, np_out - query_dim)))
        # dropout p=0.0 -> identity at inference; nothing to do.

    def __call__(self, x, context=None, mask=None):
        assert mask is None  # TODO(synk): attention mask (masked_fill) path not implemented
        B, N, _ = x.shape
        H, d = self.heads, self.dim_head
        inner = H * d
        fused_cols_ok = (inner % 128 == 0)

        if context is None:
            # Fused Q/K/V projection: x read from HBM once, single GEMM.
            qkv = pallas_matmul(x.reshape(B * N, -1), self.w_qkv_p).reshape(B, N, 3 * inner)
            if fused_cols_ok:
                q_arr = k_arr = v_arr = qkv
                q_col, k_col, v_col = 0, 1, 2
            else:
                q_arr = qkv[..., :inner]
                k_arr = qkv[..., inner:2 * inner]
                v_arr = qkv[..., 2 * inner:]
                q_col = k_col = v_col = 0
        else:
            Nc = context.shape[1]
            q_arr = pallas_matmul(x.reshape(B * N, -1), self.w_q_p).reshape(B, N, inner)
            kv = pallas_matmul(context.reshape(B * Nc, -1), self.w_kv_p).reshape(B, Nc, 2 * inner)
            q_col = 0
            if fused_cols_ok:
                k_arr = v_arr = kv
                k_col, v_col = 0, 1
            else:
                k_arr, v_arr = kv[..., :inner], kv[..., inner:]
                k_col = v_col = 0

        # Attention consumes/produces the (B, N, H*d) layout directly; Q/K/V slabs are
        # selected via column-offset index maps (no wrapper-side split copies).
        out = pallas_attention(q_arr, k_arr, v_arr, heads=H, dim_head=d,
                               q_col=q_col, k_col=k_col, v_col=v_col)

        # Output projection with fused bias add (f32 output).
        out = pallas_matmul(out.reshape(B * N, inner), self.w_out_p,
                            bias=self.b_out_pad, out_dtype=jnp.float32)
        return out.reshape(B, N, self.query_dim)


# ----------------------------------------------------------------------------
# Pure-JAX reference (f32 weights)
# ----------------------------------------------------------------------------
def reference_forward(mod, x, context=None):
    B, N, _ = x.shape
    H, d = mod.heads, mod.dim_head
    ctx = x if context is None else context
    Nc = ctx.shape[1]
    q = x @ mod.ref_w_q
    kv = ctx @ mod.ref_w_kv
    k, v = kv[..., :H * d], kv[..., H * d:]

    def sh(t, n):
        return t.reshape(B, n, H, d).transpose(0, 2, 1, 3).reshape(B * H, n, d)

    qh, kh, vh = sh(q, N), sh(k, Nc), sh(v, Nc)
    sim = jnp.einsum('bid,bjd->bij', qh, kh) * mod.scale
    attn = jax.nn.softmax(sim, axis=-1)
    out = jnp.einsum('bij,bjd->bid', attn, vh)
    out = out.reshape(B, H, N, d).transpose(0, 2, 1, 3).reshape(B, N, H * d)
    return out @ mod.ref_w_out + mod.b_out


# ----------------------------------------------------------------------------
if __name__ == "__main__":
    key = jax.random.PRNGKey(0)
    kx, kc = jax.random.split(key)
    B, N, Nc, query_dim = 2, 8, 16, 32
    heads, dim_head = 4, 32          # inner = 128 (lane-aligned -> fused QKV column path)

    x = jax.random.normal(kx, (B, N, query_dim), jnp.float32)
    ctx = jax.random.normal(kc, (B, Nc, query_dim), jnp.float32)

    # f32 compute path: tight check (only approx-reciprocal deviation expected).
    mod_f32 = AttentionPallas(query_dim, heads=heads, dim_head=dim_head,
                              key=jax.random.PRNGKey(1), compute_dtype=jnp.float32)
    out_f32 = jax.block_until_ready(mod_f32(x))
    ref_self = reference_forward(mod_f32, x)
    assert out_f32.shape == (B, N, query_dim)
    assert jnp.allclose(out_f32, ref_self, atol=2e-2, rtol=2e-2), "f32 self-attn mismatch"

    out_x = jax.block_until_ready(mod_f32(x, context=ctx))
    ref_x = reference_forward(mod_f32, x, context=ctx)
    assert out_x.shape == (B, N, query_dim)
    assert jnp.allclose(out_x, ref_x, atol=2e-2, rtol=2e-2), "f32 cross-attn mismatch"

    # bf16 compute path (MXU-native operands), f32 accumulation.
    mod_bf16 = AttentionPallas(query_dim, heads=heads, dim_head=dim_head,
                               key=jax.random.PRNGKey(1), compute_dtype=jnp.bfloat16)
    out_bf16 = jax.block_until_ready(mod_bf16(x))
    assert out_bf16.shape == (B, N, query_dim)
    assert jnp.allclose(out_bf16, ref_self, atol=1e-1, rtol=1e-1), "bf16 self-attn mismatch"

    print("KERNEL_OK")
</pallas_src>

<mosaic_0001>
module attributes {stable_mosaic.version = 11 : i64} {
  func.func @_matmul_kernel(%arg0: i32, %arg1: i32, %arg2: memref<16x32xf32, #tpu.memory_space<vmem>>, %arg3: memref<32x384xf32, #tpu.memory_space<vmem>>, %arg4: memref<16x384xf32, #tpu.memory_space<vmem>>) attributes {dimension_semantics = [#tpu.dimension_semantics<parallel>, #tpu.dimension_semantics<parallel>], iteration_bounds = array<i64: 1, 1>, scalar_prefetch = 0 : i64, scratch_operands = 0 : i64, tpu.core_type = #tpu.core_type<tc>, window_params = [{transform_indices = @transform_0, window_bounds = array<i64: 16, 32>}, {transform_indices = @transform_1, window_bounds = array<i64: 32, 384>}, {transform_indices = @transform_2, window_bounds = array<i64: 16, 384>}]} {
    %c0 = arith.constant 0 : index
    %c0_0 = arith.constant 0 : index
    %0 = vector.load %arg2[%c0, %c0_0] : memref<16x32xf32, #tpu.memory_space<vmem>>, vector<16x32xf32>
    %c0_1 = arith.constant 0 : index
    %c0_2 = arith.constant 0 : index
    %1 = vector.load %arg3[%c0_1, %c0_2] : memref<32x384xf32, #tpu.memory_space<vmem>>, vector<32x384xf32>
    %cst = arith.constant dense<0.000000e+00> : vector<16x384xf32>
    %2 = tpu.matmul %0, %1, %cst {dimension_numbers = #tpu.dot_dimension_numbers<[1], [0], [0], [1], [0, 0, 1, 1], [], []>} : vector<16x32xf32>, vector<32x384xf32>, vector<16x384xf32> -> vector<16x384xf32>
    %c0_3 = arith.constant 0 : index
    %c0_4 = arith.constant 0 : index
    %3 = vector.load %arg4[%c0_3, %c0_4] : memref<16x384xf32, #tpu.memory_space<vmem>>, vector<16x384xf32>
    tpu.vector_store %arg4[%c0_3, %c0_4], %2 {strides = array<i32>} : memref<16x384xf32, #tpu.memory_space<vmem>>, vector<16x384xf32>,
    return
  }
  func.func @transform_0(%arg0: i32, %arg1: i32) -> (i32, i32) {
    %c0_i32 = arith.constant 0 : i32
    %c0_i32_0 = arith.constant 0 : i32
    return %arg0, %c0_i32 : i32, i32
  }
  func.func @transform_1(%arg0: i32, %arg1: i32) -> (i32, i32) {
    %c0_i32 = arith.constant 0 : i32
    %c0_i32_0 = arith.constant 0 : i32
    return %c0_i32, %arg1 : i32, i32
  }
  func.func @transform_2(%arg0: i32, %arg1: i32) -> (i32, i32) {
    %c0_i32 = arith.constant 0 : i32
    return %arg0, %arg1 : i32, i32
  }
}

</mosaic_0001>

<bundles_post_ra>
// kernel: tpu_custom_call.1
= control target key start
LH: loop header
LB: loop body
LE: loop exit
PB: predicated region body
PF: predicated region fallthrough
CT: control target
= control target key end

     0   :  { %7 = vsyncpa [#allocation3], 0  ;;  %s298_s0 = inlined_call_operand.hbm [shape: f32[16,32], index: 0, kind: input, shape index: {}]   ;;  %s299_s1 = inlined_call_operand.hbm [shape: f32[32,384], index: 1, kind: input, shape index: {}]   ;;  %s300_s2 = inlined_call_operand.hbm [shape: f32[16,384], index: 2, kind: output, shape index: {}]  }
   0x1   :  { %8 = vsyncpa [#allocation6], 0 }
   0x2   :  { %9 = vsyncpa [#allocation4], 0  ;;  %s14_s11 = sshll.u32 %s298_s0, 4  ;;  %s255_s12 = smov [#allocation2]   ;;  %s15_s11 = int_to_ptr.hbm [resolvable:$true] %s14_s11 }
   0x3   :  { %s16_s13 = sshll.u32 %s255_s12, 4  ;;  %s27_s16 = sshll.u32 %s299_s1, 4  ;;  %s17_s13 = int_to_ptr.vmem [resolvable:$true] %s16_s13  ;;  %s28_s16 = int_to_ptr.hbm [resolvable:$true] %s27_s16 }
   0x4   :  { %s256_s17 = smov 128   ;;  %s257_s18 = smov 8  }
   0x5   :  { %22 = dma.hbm_to_vmem [thread:$0]  %s15_s11, 256, %s17_s13, [#allocation3], %s256_s17, %s256_s17, %s257_s18  }
   0x6   :  { %s258_s19 = smov [#allocation5]   ;;  %s259_s21 = smov 384  }
   0x7   :  { %s29_s20 = sshll.u32 %s258_s19, 4  ;;  %s260_s22 = smov 24   ;;  %s30_s20 = int_to_ptr.vmem [resolvable:$true] %s29_s20 }
   0x8   :  { %35 = dma.hbm_to_vmem [thread:$0]  %s28_s16, 1536, %s30_s20, [#allocation6], %s259_s21, %s259_s21, %s260_s22  }
   0x9   :  { %249 = dma.done.wait [#allocation3], 256  }
   0xa   :  { %250 = vsyncadd [#allocation3], 4294967040 }
   0xb   :  { %251 = dma.done.wait [#allocation6], 1536  }
   0xc   :  { %252 = vsyncadd [#allocation6], 4294965760  ;;  %v57_v0 = vld [vmem:[#allocation5 + $0x58] sm:$0xff]  ;;  %v54_v1 = vld [vmem:[#allocation5 + $0x40] sm:$0xff]  ;;  %vm58_vm0 = vcmask 261120   ;;  %s261_s0 = smov [#allocation7]  }
   0xd   :  { %123 = vmatpush.msra.mxu2 %v57_v0  ;;  %v51_v2 = vld [vmem:[#allocation5 + $0x28] sm:$0xff]  ;;  %v56_v3 = vld [vmem:[#allocation5 + $0x50] sm:$0xff]  ;;  %v53_v5 = vld [vmem:[#allocation5 + $0x38] sm:$0xff]  ;;  %s144_s1 = sshll.u32 %s261_s0, 4  ;;  %s146_s25 = sshll.u32 %s300_s2, 4  ;;  %s145_s1 = int_to_ptr.vmem [resolvable:$true] %s144_s1  ;;  %s147_s25 = int_to_ptr.hbm [resolvable:$true] %s146_s25 }
   0xe   :  { %100 = vmatpush.msra.mxu1 %v56_v3  ;;  %v55_v4 = vld [vmem:[#allocation5 + $0x48] sm:$0xff]  ;;  %v52_v6 = vld [vmem:[#allocation5 + $0x30] sm:$0xff]  ;;  %v50_v7 = vld [vmem:[#allocation5 + $0x20] sm:$0xff] }
   0xf   :  { %124 = vmatpush.msra.mxu2 %v54_v1  ;;  %166 = vmatpush.msra.mxu3 %v55_v4  ;;  %v48_v8 = vld [vmem:[#allocation5 + $0x10] sm:$0xff]  ;;  %v49_v9 = vld [vmem:[#allocation5 + $0x18] sm:$0xff]  ;;  %v47_v11 = vld [vmem:[#allocation5 + $0x8] sm:$0xff] }
  0x10   :  { %101 = vmatpush.msra.mxu1 %v53_v5  ;;  %77 = vmatpush.msra.mxu0 %v55_v4  ;;  %v44_v10 = vld [vmem:[#allocation2] sm:$0xff]  ;;  %v46_v12 = vld [vmem:[#allocation5] sm:$0xff]  ;;  %v45_v13 = vld [vmem:[#allocation2 + $0x8] sm:$0xff] }
  0x11   :  { %125 = vmatpush.msra.mxu2 %v51_v2  ;;  %167 = vmatpush.msra.mxu3 %v52_v6 }
  0x12   :  { %102 = vmatpush.msra.mxu1 %v50_v7  ;;  %78 = vmatpush.msra.mxu0 %v52_v6 }
  0x13   :  { %126 = vmatpush.msra.mxu2 %v48_v8  ;;  %168 = vmatpush.msra.mxu3 %v49_v9 }
  0x14   :  { %164 = vmatmul.msk.f32.vlgmr.msra.gmra.mxu2 %vm58_vm0, %v44_v10  ;;  %103 = vmatpush.msra.mxu1 %v47_v11 }
  0x15   :  { %162 = vmatmul.msk.f32.vlgmr.msra.gmra.mxu1 %vm58_vm0, %v44_v10  ;;  %169 = vmatpush.msra.mxu3 %v46_v12 }
  0x16   :  { %161 = vmatmul.msk.f32.vlgmr.msra.gmra.mxu3 %vm58_vm0, %v45_v13  ;;  %79 = vmatpush.msra.mxu0 %v49_v9 }
  0x18   :  { %80 = vmatpush.msra.mxu0 %v46_v12 }
  0x19   :  { %160 = vmatmul.msk.f32.vlgmr.msra.gmra.mxu0 %vm58_vm0, %v44_v10 }
  0x1c   :  { %165 = vmatmul.msk.f32.gmra.mxu2 %vm58_vm0, %v45_v13 }
  0x1d   :  { %163 = vmatmul.msk.f32.gmra.mxu1 %vm58_vm0, %v45_v13 }
  0x92   :  { %v105_v14 = vpop.f32.mrf.mxu1 }
  0x93   :  { %135 = vst [vmem:[#allocation7 + $0x8] sm:$0xff] %v105_v14 }
  0x96   :  { %v82_v15 = vpop.f32.mrf.mxu0 }
  0x97   :  { %v128_v16 = vpop.f32.mrf.mxu2  ;;  %134 = vst [vmem:[#allocation7] sm:$0xff] %v82_v15 }
  0x98   :  { %136 = vst [vmem:[#allocation7 + $0x10] sm:$0xff] %v128_v16 }
  0x99   :  { %v85_v17 = vpop.f32.mrf.mxu3 }
  0x9a   :  { %137 = vst [vmem:[#allocation7 + $0x18] sm:$0xff] %v85_v17  ;;  %v108_v18 = vpop.f32.mrf.mxu1 }
  0x9b   :  { %138 = vst [vmem:[#allocation7 + $0x20] sm:$0xff] %v108_v18 }
  0x9f   :  { %v131_v19 = vpop.f32.mrf.mxu2 }
  0xa0   :  { %139 = vst [vmem:[#allocation7 + $0x28] sm:$0xff] %v131_v19 }
  0xa1   :  { %152 = dma.vmem_to_hbm [thread:$0]  %s145_s1, 768, %s147_s25, [#allocation4], %s259_s21, %s259_s21, %s260_s22  }
  0xa2   :  { %253 = dma.done.wait [#allocation4], 768  }
  0xa3   :  { %254 = vsyncadd [#allocation4], 4294966528 }
  0xa4   :  { %157 = vsyncpa [#allocation3], 1 }
  0xa5   :  { %158 = vsyncpa [#allocation6], 1 }
  0xa6   :  { %159 = vsyncpa [#allocation4], 1 }

</bundles_post_ra>
